<compile_context>
chip_gen: v6e
topology: v6e:2x2x1
jax: 0.10.0
libtpu: 0.0.40
codegen_flags: <defaults>
</compile_context>

<pallas_src>
import math

import jax
import jax.numpy as jnp
import numpy as np
from jax.experimental import pallas as pl
from jax.experimental.pallas import tpu as pltpu

_NEG_BIG = -1e30  # "minus infinity" that stays NaN-free through exp/max


def _pack_coefficients(mu, L, weights):
    """Fold all per-cluster parameters into polynomial coefficients of log p_i(x).

    log p_i(x) = gamma_i + sum_{a<=b} q_ab * x_a * x_b + sum_a l_a * x_a  with
      q_aa = -0.5 * Sinv[a,a],  q_ab = -Sinv[a,b] (a<b),  l = Sinv @ mu,
      gamma = log_softmax(w)_i - 0.5*(D*log(2*pi) + logdet(Sigma) + mu^T Sinv mu)

    Returns a flat float32 vector of shape (K * (D*(D+1)//2 + D + 1),).
    """
    K, D = mu.shape
    tril = jnp.tril(L)
    sig = tril @ jnp.swapaxes(tril, -1, -2) + jnp.eye(D, dtype=L.dtype)
    sig = 0.5 * (sig + jnp.swapaxes(sig, -1, -2))          # exact symmetry
    if D == 2:
        # Closed-form 2x2 inverse / determinant (no jnp.linalg on tiny batches).
        a = sig[:, 0, 0]
        b = sig[:, 0, 1]
        d = sig[:, 1, 1]
        det = a * d - b * b
        inv_det = 1.0 / det
        sinv = jnp.stack(
            [jnp.stack([d * inv_det, -b * inv_det], axis=-1),
             jnp.stack([-b * inv_det, a * inv_det], axis=-1)],
            axis=-2)                                       # (K, 2, 2)
        logdet = jnp.log(det)
    else:  # general (small) D fallback
        sinv = jnp.linalg.inv(sig)
        sinv = 0.5 * (sinv + jnp.swapaxes(sinv, -1, -2))
        logdet = jnp.linalg.slogdet(sig)[1]

    log_w = jax.nn.log_softmax(weights)
    s_mu = jnp.einsum("kab,kb->ka", sinv, mu)              # (K, D)
    mu_s_mu = jnp.einsum("ka,ka->k", mu, s_mu)             # (K,)
    gamma = log_w - 0.5 * (D * math.log(2.0 * math.pi) + logdet + mu_s_mu)

    cols = []
    for p in range(D):
        for q in range(p, D):
            cols.append(-0.5 * sinv[:, p, p] if p == q else -sinv[:, p, q])
    cols += [s_mu[:, p] for p in range(D)]
    cols.append(gamma)
    coef = jnp.stack(cols, axis=-1)                        # (K, n_quad + D + 1)
    return coef.reshape(-1).astype(jnp.float32)


def _make_gmm_kernel(n_clusters, n_dims, n_tiles, tile_rows, n_valid):
    n_quad = n_dims * (n_dims + 1) // 2
    stride = n_quad + n_dims + 1
    tile = tile_rows * 128

    def kernel(coef_ref, x_ref, m_ref, s_ref, m_acc, s_acc):
        p = pl.program_id(0)   # parallel chunk index
        t = pl.program_id(1)   # accumulation tile within the chunk

        @pl.when(t == 0)
        def _():
            m_acc[...] = jnp.full(m_acc.shape, _NEG_BIG, jnp.float32)
            s_acc[...] = jnp.zeros(s_acc.shape, jnp.float32)

        x = x_ref[...]                                     # (1, D, tile_rows, 128)
        coords = [x[0, a] for a in range(n_dims)]          # each (tile_rows, 128)
        # Shared pairwise products (a <= b), reused by every cluster.
        prods = [coords[a] * coords[b]
                 for a in range(n_dims) for b in range(a, n_dims)]

        # Hoist every SMEM scalar read ahead of the vector math.
        coefs = [coef_ref[j] for j in range(n_clusters * stride)]

        pdf = jnp.zeros((tile_rows, 128), jnp.float32)
        for i in range(n_clusters):
            c = coefs[i * stride:(i + 1) * stride]
            log_p = c[n_quad + n_dims] + c[0] * prods[0]
            for q in range(1, n_quad):
                log_p = log_p + c[q] * prods[q]
            for a in range(n_dims):
                log_p = log_p + c[n_quad + a] * coords[a]
            pdf = pdf + jnp.exp(log_p)

        log_lik = jnp.log(pdf)                             # (tile_rows, 128)

        # Mask padded samples (global index >= n_valid).
        base = (p * n_tiles + t) * tile
        row = jax.lax.broadcasted_iota(jnp.int32, (tile_rows, 128), 0)
        lane = jax.lax.broadcasted_iota(jnp.int32, (tile_rows, 128), 1)
        idx = base + row * 128 + lane
        log_lik = jnp.where(idx < n_valid, log_lik, _NEG_BIG)

        # Online logsumexp accumulation over tiles (lane-replicated state).
        tile_m = jnp.max(jnp.max(log_lik, axis=1, keepdims=True),
                         axis=0, keepdims=True)            # (1, 1)
        m_old = m_acc[...]                                 # (1, 128)
        m_new = jnp.maximum(m_old, tile_m)                 # (1, 128)
        scaled = jnp.exp(log_lik - m_new)                  # (tile_rows, 128)
        tile_s = jnp.sum(jnp.sum(scaled, axis=1, keepdims=True),
                         axis=0, keepdims=True)            # (1, 1)
        s_new = s_acc[...] * jnp.exp(m_old - m_new) + tile_s
        m_acc[...] = m_new
        s_acc[...] = s_new

        # Publish this chunk's running partial (lane-dense output block).
        m_ref[...] = m_new.reshape(1, 1, 128)
        s_ref[...] = s_new.reshape(1, 1, 128)

    return kernel


def gmm_neg_logsumexp_loss(X, mu, L, weights, *, tile_rows=8, n_parallel=2):
    """Equivalent of MultivariateGaussianMixture.forward(X, it) (monitoring off).

    tile_rows: sublane rows per grid step; each step processes tile_rows*128
      samples.  For large N raise it (e.g. 256-512) while keeping the X block
      (D * tile_rows * 128 * 4 B, double-buffered) well inside scoped VMEM --
      the explicit vmem_limit below is safe for v7x's 64 MiB physical VMEM.
    n_parallel: leading "parallel" grid axis so the two v7x TensorCores each
      reduce a contiguous chunk of samples; partial (m, s) pairs are combined
      in a tiny epilogue.  Harmless (sequential) on single-core v5e/v6e.
    """
    n, d = X.shape
    k = mu.shape[0]

    coef = _pack_coefficients(mu.astype(jnp.float32), L.astype(jnp.float32),
                              weights.astype(jnp.float32))

    tile = tile_rows * 128
    tiles_needed = max(1, -(-n // tile))
    n_par = max(1, n_parallel)
    n_tiles = -(-tiles_needed // n_par)
    n_pad = n_par * n_tiles * tile

    x_pad = jnp.pad(X.astype(jnp.float32), ((0, n_pad - n), (0, 0)))  # (n_pad, D)
    # (n_par, D, n_tiles*tile_rows, 128): samples lane-dense on the last axis.
    x4 = x_pad.T.reshape(d, n_par, n_tiles * tile_rows, 128).transpose(1, 0, 2, 3)

    kernel = _make_gmm_kernel(k, d, n_tiles, tile_rows, n)

    grid_spec = pltpu.PrefetchScalarGridSpec(
        num_scalar_prefetch=1,                 # coefficient table lives in SMEM
        grid=(n_par, n_tiles),
        in_specs=[
            pl.BlockSpec((1, d, tile_rows, 128),
                         lambda p, t, coef_ref: (p, 0, t, 0)),
        ],
        out_specs=[
            pl.BlockSpec((1, 1, 128), lambda p, t, coef_ref: (p, 0, 0)),
            pl.BlockSpec((1, 1, 128), lambda p, t, coef_ref: (p, 0, 0)),
        ],
        scratch_shapes=[
            pltpu.VMEM((1, 128), jnp.float32),   # running max (lane-replicated)
            pltpu.VMEM((1, 128), jnp.float32),   # running scaled sum
        ],
    )

    m_part, s_part = pl.pallas_call(
        kernel,
        out_shape=(jax.ShapeDtypeStruct((n_par, 1, 128), jnp.float32),
                   jax.ShapeDtypeStruct((n_par, 1, 128), jnp.float32)),
        grid_spec=grid_spec,
        compiler_params=pltpu.CompilerParams(
            dimension_semantics=("parallel", "arbitrary"),
            vmem_limit_bytes=32 * 1024 * 1024,
        ),
    )(coef, x4)

    # Combine per-chunk (max, scaled-sum) partials: two-stage logsumexp.
    m_p = m_part[:, 0, 0]                     # (n_par,)
    s_p = s_part[:, 0, 0]
    m_tot = jnp.max(m_p)
    s_tot = jnp.sum(s_p * jnp.exp(m_p - m_tot))
    return -(m_tot + jnp.log(s_tot))


def _reference(X, mu, L, weights):
    """Pure-JAX re-statement of the PyTorch forward for validation."""
    d = mu.shape[1]
    tril = jnp.tril(L)
    sig = tril @ jnp.swapaxes(tril, -1, -2) + jnp.eye(d, dtype=L.dtype)
    sinv = jnp.linalg.inv(sig)
    logdet = jnp.log(jnp.linalg.det(sig))
    logw = jax.nn.log_softmax(weights)
    diff = X[None, :, :] - mu[:, None, :]                      # (K, N, D)
    quad = jnp.einsum("knd,kde,kne->kn", diff, sinv, diff)     # (K, N)
    logp = logw[:, None] - 0.5 * (d * math.log(2 * math.pi) + logdet[:, None] + quad)
    pdf = jnp.sum(jnp.exp(logp), axis=0)                       # (N,)
    return -jax.scipy.special.logsumexp(jnp.log(pdf))


if __name__ == "__main__":
    # Module configuration: n_clusters=3, n_dims=2; N=8 samples.
    K, D, N = 3, 2, 8

    # Deterministic parameter init exactly as the module's __init__:
    #   mu_i = zeros(D), L_i = ones(D, D), weights = zeros(K)
    mu = jnp.zeros((K, D), jnp.float32)
    L = jnp.ones((K, D, D), jnp.float32)
    weights = jnp.zeros((K,), jnp.float32)

    # Deterministic example input (samples of dimension D).
    X = jax.random.normal(jax.random.PRNGKey(0), (N, D), dtype=jnp.float32)

    out = jax.block_until_ready(gmm_neg_logsumexp_loss(X, mu, L, weights))
    ref = jax.block_until_ready(_reference(X, mu, L, weights))
    assert np.allclose(np.asarray(out), np.asarray(ref), rtol=1e-4, atol=1e-5), (out, ref)

    # TODO(synk): TensorBoard monitoring hooks (add_means/add_weights/add_loss)
    # have no kernel equivalent and are omitted (monitoring disabled path).
    # TODO(synk): the PyTorch module uses float64 parameters; TPU kernel runs in float32.
    print("KERNEL_OK")
</pallas_src>

<mosaic_0001>
module attributes {stable_mosaic.version = 11 : i64} {
  func.func @kernel(%arg0: i32, %arg1: i32, %arg2: memref<18xf32, #tpu.memory_space<smem>>, %arg3: memref<1x2x8x128xf32, #tpu.memory_space<vmem>>, %arg4: memref<1x1x128xf32, #tpu.memory_space<vmem>>, %arg5: memref<1x1x128xf32, #tpu.memory_space<vmem>>, %arg6: memref<1x128xf32, #tpu.memory_space<vmem>>, %arg7: memref<1x128xf32, #tpu.memory_space<vmem>>) attributes {dimension_semantics = [#tpu.dimension_semantics<parallel>, #tpu.dimension_semantics<arbitrary>], iteration_bounds = array<i64: 2, 1>, scalar_prefetch = 1 : i64, scratch_operands = 2 : i64, tpu.core_type = #tpu.core_type<tc>, window_params = [{transform_indices = @transform_0, window_bounds = array<i64: 1, 2, 8, 128>}, {transform_indices = @transform_1, window_bounds = array<i64: 1, 1, 128>}, {transform_indices = @transform_2, window_bounds = array<i64: 1, 1, 128>}]} {
    %c0_i32 = arith.constant 0 : i32
    %0 = arith.cmpi eq, %arg1, %c0_i32 : i32
    %1 = arith.extui %0 : i1 to i32
    %c0_i32_0 = arith.constant 0 : i32
    %2 = arith.cmpi ne, %1, %c0_i32_0 : i32
    scf.if %2 {
      %cst_24 = arith.constant -1.000000e+30 : f32
      %125 = vector.broadcast %cst_24 : f32 to vector<1x128xf32>
      %c0_25 = arith.constant 0 : index
      %c0_26 = arith.constant 0 : index
      %126 = vector.load %arg6[%c0_25, %c0_26] : memref<1x128xf32, #tpu.memory_space<vmem>>, vector<1x128xf32>
      tpu.vector_store %arg6[%c0_25, %c0_26], %125 {strides = array<i32>} : memref<1x128xf32, #tpu.memory_space<vmem>>, vector<1x128xf32>,
      %cst_27 = arith.constant 0.000000e+00 : f32
      %127 = vector.broadcast %cst_27 : f32 to vector<1x128xf32>
      %c0_28 = arith.constant 0 : index
      %c0_29 = arith.constant 0 : index
      %128 = vector.load %arg7[%c0_28, %c0_29] : memref<1x128xf32, #tpu.memory_space<vmem>>, vector<1x128xf32>
      tpu.vector_store %arg7[%c0_28, %c0_29], %127 {strides = array<i32>} : memref<1x128xf32, #tpu.memory_space<vmem>>, vector<1x128xf32>,
    } else {
    }
    %c0 = arith.constant 0 : index
    %c0_1 = arith.constant 0 : index
    %c0_2 = arith.constant 0 : index
    %c0_3 = arith.constant 0 : index
    %3 = vector.load %arg3[%c0, %c0_1, %c0_2, %c0_3] : memref<1x2x8x128xf32, #tpu.memory_space<vmem>>, vector<1x2x8x128xf32>
    %4 = vector.extract_strided_slice %3 {offsets = [0, 0, 0, 0], sizes = [1, 1, 8, 128], strides = [1, 1, 1, 1]} : vector<1x2x8x128xf32> to vector<1x1x8x128xf32>
    %5 = vector.shape_cast %4 : vector<1x1x8x128xf32> to vector<8x128xf32>
    %6 = vector.extract_strided_slice %3 {offsets = [0, 1, 0, 0], sizes = [1, 1, 8, 128], strides = [1, 1, 1, 1]} : vector<1x2x8x128xf32> to vector<1x1x8x128xf32>
    %7 = vector.shape_cast %6 : vector<1x1x8x128xf32> to vector<8x128xf32>
    %8 = arith.mulf %5, %5 : vector<8x128xf32>
    %9 = arith.mulf %5, %7 : vector<8x128xf32>
    %10 = arith.mulf %7, %7 : vector<8x128xf32>
    %c0_4 = arith.constant 0 : index
    %11 = memref.load %arg2[%c0_4] : memref<18xf32, #tpu.memory_space<smem>>
    %c1 = arith.constant 1 : index
    %12 = memref.load %arg2[%c1] : memref<18xf32, #tpu.memory_space<smem>>
    %c2 = arith.constant 2 : index
    %13 = memref.load %arg2[%c2] : memref<18xf32, #tpu.memory_space<smem>>
    %c3 = arith.constant 3 : index
    %14 = memref.load %arg2[%c3] : memref<18xf32, #tpu.memory_space<smem>>
    %c4 = arith.constant 4 : index
    %15 = memref.load %arg2[%c4] : memref<18xf32, #tpu.memory_space<smem>>
    %c5 = arith.constant 5 : index
    %16 = memref.load %arg2[%c5] : memref<18xf32, #tpu.memory_space<smem>>
    %c6 = arith.constant 6 : index
    %17 = memref.load %arg2[%c6] : memref<18xf32, #tpu.memory_space<smem>>
    %c7 = arith.constant 7 : index
    %18 = memref.load %arg2[%c7] : memref<18xf32, #tpu.memory_space<smem>>
    %c8 = arith.constant 8 : index
    %19 = memref.load %arg2[%c8] : memref<18xf32, #tpu.memory_space<smem>>
    %c9 = arith.constant 9 : index
    %20 = memref.load %arg2[%c9] : memref<18xf32, #tpu.memory_space<smem>>
    %c10 = arith.constant 10 : index
    %21 = memref.load %arg2[%c10] : memref<18xf32, #tpu.memory_space<smem>>
    %c11 = arith.constant 11 : index
    %22 = memref.load %arg2[%c11] : memref<18xf32, #tpu.memory_space<smem>>
    %c12 = arith.constant 12 : index
    %23 = memref.load %arg2[%c12] : memref<18xf32, #tpu.memory_space<smem>>
    %c13 = arith.constant 13 : index
    %24 = memref.load %arg2[%c13] : memref<18xf32, #tpu.memory_space<smem>>
    %c14 = arith.constant 14 : index
    %25 = memref.load %arg2[%c14] : memref<18xf32, #tpu.memory_space<smem>>
    %c15 = arith.constant 15 : index
    %26 = memref.load %arg2[%c15] : memref<18xf32, #tpu.memory_space<smem>>
    %c16 = arith.constant 16 : index
    %27 = memref.load %arg2[%c16] : memref<18xf32, #tpu.memory_space<smem>>
    %c17 = arith.constant 17 : index
    %28 = memref.load %arg2[%c17] : memref<18xf32, #tpu.memory_space<smem>>
    %cst = arith.constant 0.000000e+00 : f32
    %29 = vector.broadcast %cst : f32 to vector<8x128xf32>
    %30 = vector.broadcast %11 : f32 to vector<8x128xf32>
    %31 = arith.mulf %30, %8 : vector<8x128xf32>
    %32 = vector.broadcast %16 : f32 to vector<8x128xf32>
    %33 = arith.addf %32, %31 : vector<8x128xf32>
    %34 = vector.broadcast %12 : f32 to vector<8x128xf32>
    %35 = arith.mulf %34, %9 : vector<8x128xf32>
    %36 = arith.addf %33, %35 : vector<8x128xf32>
    %37 = vector.broadcast %13 : f32 to vector<8x128xf32>
    %38 = arith.mulf %37, %10 : vector<8x128xf32>
    %39 = arith.addf %36, %38 : vector<8x128xf32>
    %40 = vector.broadcast %14 : f32 to vector<8x128xf32>
    %41 = arith.mulf %40, %5 : vector<8x128xf32>
    %42 = arith.addf %39, %41 : vector<8x128xf32>
    %43 = vector.broadcast %15 : f32 to vector<8x128xf32>
    %44 = arith.mulf %43, %7 : vector<8x128xf32>
    %45 = arith.addf %42, %44 : vector<8x128xf32>
    %46 = math.exp %45 : vector<8x128xf32>
    %47 = arith.addf %29, %46 : vector<8x128xf32>
    %48 = vector.broadcast %17 : f32 to vector<8x128xf32>
    %49 = arith.mulf %48, %8 : vector<8x128xf32>
    %50 = vector.broadcast %22 : f32 to vector<8x128xf32>
    %51 = arith.addf %50, %49 : vector<8x128xf32>
    %52 = vector.broadcast %18 : f32 to vector<8x128xf32>
    %53 = arith.mulf %52, %9 : vector<8x128xf32>
    %54 = arith.addf %51, %53 : vector<8x128xf32>
    %55 = vector.broadcast %19 : f32 to vector<8x128xf32>
    %56 = arith.mulf %55, %10 : vector<8x128xf32>
    %57 = arith.addf %54, %56 : vector<8x128xf32>
    %58 = vector.broadcast %20 : f32 to vector<8x128xf32>
    %59 = arith.mulf %58, %5 : vector<8x128xf32>
    %60 = arith.addf %57, %59 : vector<8x128xf32>
    %61 = vector.broadcast %21 : f32 to vector<8x128xf32>
    %62 = arith.mulf %61, %7 : vector<8x128xf32>
    %63 = arith.addf %60, %62 : vector<8x128xf32>
    %64 = math.exp %63 : vector<8x128xf32>
    %65 = arith.addf %47, %64 : vector<8x128xf32>
    %66 = vector.broadcast %23 : f32 to vector<8x128xf32>
    %67 = arith.mulf %66, %8 : vector<8x128xf32>
    %68 = vector.broadcast %28 : f32 to vector<8x128xf32>
    %69 = arith.addf %68, %67 : vector<8x128xf32>
    %70 = vector.broadcast %24 : f32 to vector<8x128xf32>
    %71 = arith.mulf %70, %9 : vector<8x128xf32>
    %72 = arith.addf %69, %71 : vector<8x128xf32>
    %73 = vector.broadcast %25 : f32 to vector<8x128xf32>
    %74 = arith.mulf %73, %10 : vector<8x128xf32>
    %75 = arith.addf %72, %74 : vector<8x128xf32>
    %76 = vector.broadcast %26 : f32 to vector<8x128xf32>
    %77 = arith.mulf %76, %5 : vector<8x128xf32>
    %78 = arith.addf %75, %77 : vector<8x128xf32>
    %79 = vector.broadcast %27 : f32 to vector<8x128xf32>
    %80 = arith.mulf %79, %7 : vector<8x128xf32>
    %81 = arith.addf %78, %80 : vector<8x128xf32>
    %82 = math.exp %81 : vector<8x128xf32>
    %83 = arith.addf %65, %82 : vector<8x128xf32>
    %84 = math.log %83 : vector<8x128xf32>
    %c1_i32 = arith.constant 1 : i32
    %85 = arith.muli %arg0, %c1_i32 : i32
    %86 = arith.addi %85, %arg1 : i32
    %c1024_i32 = arith.constant 1024 : i32
    %87 = arith.muli %86, %c1024_i32 : i32
    %88 = tpu.iota {dimensions = array<i32: 0>} : vector<8x128xi32>
    %89 = tpu.iota {dimensions = array<i32: 1>} : vector<8x128xi32>
    %c128_i32 = arith.constant 128 : i32
    %90 = vector.broadcast %c128_i32 : i32 to vector<8x128xi32>
    %91 = arith.muli %88, %90 : vector<8x128xi32>
    %92 = vector.broadcast %87 : i32 to vector<8x128xi32>
    %93 = arith.addi %92, %91 : vector<8x128xi32>
    %94 = arith.addi %93, %89 : vector<8x128xi32>
    %c8_i32 = arith.constant 8 : i32
    %95 = vector.broadcast %c8_i32 : i32 to vector<8x128xi32>
    %96 = arith.cmpi slt, %94, %95 : vector<8x128xi32>
    %cst_5 = arith.constant -1.000000e+30 : f32
    %97 = vector.broadcast %cst_5 : f32 to vector<8x128xf32>
    %98 = arith.select %96, %84, %97 : vector<8x128xi1>, vector<8x128xf32>
    %cst_6 = arith.constant dense<0xFF800000> : vector<8xf32>
    %99 = vector.multi_reduction <maximumf>, %98, %cst_6 [1] : vector<8x128xf32> to vector<8xf32>
    %100 = vector.shape_cast %99 : vector<8xf32> to vector<8x1xf32>
    %cst_7 = arith.constant dense<0xFF800000> : vector<1xf32>
    %101 = vector.multi_reduction <maximumf>, %100, %cst_7 [0] : vector<8x1xf32> to vector<1xf32>
    %102 = vector.shape_cast %101 : vector<1xf32> to vector<1x1xf32>
    %c0_8 = arith.constant 0 : index
    %c0_9 = arith.constant 0 : index
    %103 = vector.load %arg6[%c0_8, %c0_9] : memref<1x128xf32, #tpu.memory_space<vmem>>, vector<1x128xf32>
    %104 = vector.broadcast %102 : vector<1x1xf32> to vector<1x128xf32>
    %105 = arith.maximumf %103, %104 : vector<1x128xf32>
    %106 = vector.broadcast %105 : vector<1x128xf32> to vector<8x128xf32>
    %107 = arith.subf %98, %106 : vector<8x128xf32>
    %108 = math.exp %107 : vector<8x128xf32>
    %cst_10 = arith.constant dense<0.000000e+00> : vector<8xf32>
    %109 = vector.multi_reduction <add>, %108, %cst_10 [1] : vector<8x128xf32> to vector<8xf32>
    %110 = vector.shape_cast %109 : vector<8xf32> to vector<8x1xf32>
    %cst_11 = arith.constant dense<0.000000e+00> : vector<1xf32>
    %111 = vector.multi_reduction <add>, %110, %cst_11 [0] : vector<8x1xf32> to vector<1xf32>
    %112 = vector.shape_cast %111 : vector<1xf32> to vector<1x1xf32>
    %c0_12 = arith.constant 0 : index
    %c0_13 = arith.constant 0 : index
    %113 = vector.load %arg7[%c0_12, %c0_13] : memref<1x128xf32, #tpu.memory_space<vmem>>, vector<1x128xf32>
    %114 = arith.subf %103, %105 : vector<1x128xf32>
    %115 = math.exp %114 : vector<1x128xf32>
    %116 = arith.mulf %113, %115 : vector<1x128xf32>
    %117 = vector.broadcast %112 : vector<1x1xf32> to vector<1x128xf32>
    %118 = arith.addf %116, %117 : vector<1x128xf32>
    %c0_14 = arith.constant 0 : index
    %c0_15 = arith.constant 0 : index
    %119 = vector.load %arg6[%c0_14, %c0_15] : memref<1x128xf32, #tpu.memory_space<vmem>>, vector<1x128xf32>
    tpu.vector_store %arg6[%c0_14, %c0_15], %105 {strides = array<i32>} : memref<1x128xf32, #tpu.memory_space<vmem>>, vector<1x128xf32>,
    %c0_16 = arith.constant 0 : index
    %c0_17 = arith.constant 0 : index
    %120 = vector.load %arg7[%c0_16, %c0_17] : memref<1x128xf32, #tpu.memory_space<vmem>>, vector<1x128xf32>
    tpu.vector_store %arg7[%c0_16, %c0_17], %118 {strides = array<i32>} : memref<1x128xf32, #tpu.memory_space<vmem>>, vector<1x128xf32>,
    %121 = vector.shape_cast %105 : vector<1x128xf32> to vector<1x1x128xf32>
    %c0_18 = arith.constant 0 : index
    %c0_19 = arith.constant 0 : index
    %c0_20 = arith.constant 0 : index
    %122 = vector.load %arg4[%c0_18, %c0_19, %c0_20] : memref<1x1x128xf32, #tpu.memory_space<vmem>>, vector<1x1x128xf32>
    tpu.vector_store %arg4[%c0_18, %c0_19, %c0_20], %121 {strides = array<i32>} : memref<1x1x128xf32, #tpu.memory_space<vmem>>, vector<1x1x128xf32>,
    %123 = vector.shape_cast %118 : vector<1x128xf32> to vector<1x1x128xf32>
    %c0_21 = arith.constant 0 : index
    %c0_22 = arith.constant 0 : index
    %c0_23 = arith.constant 0 : index
    %124 = vector.load %arg5[%c0_21, %c0_22, %c0_23] : memref<1x1x128xf32, #tpu.memory_space<vmem>>, vector<1x1x128xf32>
    tpu.vector_store %arg5[%c0_21, %c0_22, %c0_23], %123 {strides = array<i32>} : memref<1x1x128xf32, #tpu.memory_space<vmem>>, vector<1x1x128xf32>,
    return
  }
  func.func @transform_0(%arg0: i32, %arg1: i32, %arg2: memref<18xf32, #tpu.memory_space<smem>>) -> (i32, i32, i32, i32) {
    %c0_i32 = arith.constant 0 : i32
    %c0_i32_0 = arith.constant 0 : i32
    %c0_i32_1 = arith.constant 0 : i32
    return %arg0, %c0_i32, %arg1, %c0_i32_0 : i32, i32, i32, i32
  }
  func.func @transform_1(%arg0: i32, %arg1: i32, %arg2: memref<18xf32, #tpu.memory_space<smem>>) -> (i32, i32, i32) {
    %c0_i32 = arith.constant 0 : i32
    %c0_i32_0 = arith.constant 0 : i32
    %c0_i32_1 = arith.constant 0 : i32
    return %arg0, %c0_i32, %c0_i32_0 : i32, i32, i32
  }
  func.func @transform_2(%arg0: i32, %arg1: i32, %arg2: memref<18xf32, #tpu.memory_space<smem>>) -> (i32, i32, i32) {
    %c0_i32 = arith.constant 0 : i32
    %c0_i32_0 = arith.constant 0 : i32
    %c0_i32_1 = arith.constant 0 : i32
    return %arg0, %c0_i32, %c0_i32_0 : i32, i32, i32
  }
}

</mosaic_0001>

<bundles_post_ra>
// kernel: tpu_custom_call.1
= control target key start
LH: loop header
LB: loop body
LE: loop exit
PB: predicated region body
PF: predicated region fallthrough
CT: control target
= control target key end

     0   :  { %s728_s12 = smov [#allocation5]   ;;  %s949_s0 = inlined_call_operand.hbm [shape: f32[18], index: 0, kind: input, shape index: {}]   ;;  %s950_s1 = inlined_call_operand.hbm [shape: f32[2,2,8,128], index: 1, kind: input, shape index: {}]   ;;  %s951_s2 = inlined_call_operand.hbm [shape: f32[2,1,128], index: 2, kind: output, shape index: {0}]   ;;  %s952_s3 = inlined_call_operand.hbm [shape: f32[2,1,128], index: 3, kind: output, shape index: {1}]  }
   0x1   :  { %10 = dma.hbm_to_smem %s949_s0, 16, %s728_s12, [#allocation4] }
   0x2   :  { %690 = dma.done.wait [#allocation4], 16 }
   0x3   :  { %691 = vsyncadd [#allocation4], 4294967280 }
   0x4   :  { %12 = sfence }
   0x5   :  { %13 = vsyncpa [#allocation7], 0 }
   0x6   :  { %15 = vsyncpa [#allocation7 + $0x1], 0 }
   0x7   :  { %16 = vsyncpa [#allocation8], 0 }
   0x8   :  { %18 = vsyncpa [#allocation8 + $0x1], 0 }
   0x9   :  { %19 = vsyncpa [#allocation11], 0 }
   0xa   :  { %21 = vsyncpa [#allocation11 + $0x1], 0  ;;  %s759_s15 = smov 0   ;;  %s761_s16 = smov 0  }
   0xb   :  { %s763_s17 = smov 0   ;;  %s765_s18 = smov 0  }
   0xc   :  { %s767_s19 = smov 0   ;;  %s769_s0 = smov 0  }
   0xd LB: > { %s462_s20 = sadd.s32 4294967295, %s726_s0   ;;  %s463_s21 = sadd.s32 4294967294, %s726_s0   ;;  %s726_s0 = sphi %s769_s0, %s27_s0   ;;  %s722_s19 = sphi %s767_s19, %s963_s19   ;;  %s718_s18 = sphi %s765_s18, %s962_s18   ;;  %s714_s17 = sphi %s763_s17, %s961_s17   ;;  %s710_s16 = sphi %s761_s16, %s960_s16   ;;  %s706_s15 = sphi %s759_s15, %s959_s15  }
   0xe   : > { %s39_s22 = sadd.s32 1, %s722_s19  ;;  %s48_s23 = sadd.s32 1, %s714_s17 }
   0xf   : > { %p41_p0 = scmp.ge.s32.totalorder %s39_s22, 2  ;;  %p55_p1 = scmp.ne.s32.totalorder %s714_s17, %s710_s16 }
  0x10   : > { %p56_p2 = scmp.eq.s32.totalorder %s726_s0, 0  ;;  %p61_p3 = scmp.ne.s32.totalorder %s710_s16, %s706_s15 }
  0x11   : > { %s965_s22 = smov (%p41_p0, %s39_s22), 0  ;;  %p62_p5 = scmp.eq.s32.totalorder %s462_s20, 0 }
  0x12   : > { %p800_p4 = por %p56_p2, %p55_p1  ;;  %s43_s25 = ssub.s32 %s722_s19, %s965_s22 }
  0x13   : > { %p85_p6 = scmp.eq.s32.totalorder %s462_s20, 1  ;;  %p46_p7 = scmp.eq.s32.totalorder %s43_s25, 0 }
  0x14   : > { %p806_p8 = por %p62_p5, %p61_p3  ;;  %p91_p10 = scmp.eq.s32.totalorder %s463_s21, 1 }
  0x15   : > { %p810_p9 = por %p85_p6, %p55_p1  ;;  %p511_p13 = scmp.lt.s32.totalorder %s726_s0, 2 }
  0x16   : > { %s815_s28 = scalar_select %p46_p7, %s714_s17, %s48_s23  }
  0x17   : > { %p817_p11 = por %p91_p10, %p61_p3  ;;  %s137_s30 = sand.u32 1, %s714_s17  }
  0x18   : > { %s466_s4 = sshll.u32 %s137_s30, 4  ;;  %s493_s5 = sshll.u32 %s722_s19, 8 }
  0x19   : > { %s148_s8 = scalar_lea.hbm %s950_s1, %s493_s5  ;;  %s141_s9 = scalar_lea.vmem [#allocation6], %s466_s4 }
  0x1a   : > { %s149_s10 = sshll.u32 %s141_s9, 4  ;;  %p830_p0 = pnand %p511_p13, %p800_p4  ;;  %s150_s10 = int_to_ptr.vmem [resolvable:$true] %s149_s10 }
  0x1b   : > { %p469_p1 = scmp.ge.s32.totalorder %s726_s0, 1  ;;  %s138_s12 = scalar_lea.sflag [#allocation7], %s137_s30 }
  0x1c   : > { %p588_p2 = pneg %p830_p0  ;;  %s599_s13 = scalar_lea.vmem %s150_s10, 256 }
  0x1d   : > { %p600_p3 = scmp.ne.s32.totalorder %s150_s10, %s599_s13  ;;  %s729_s14 = smov [#allocation6]  }
  0x1e   : > { %s604_s20 = sshll.u32 %s729_s14, 4  ;;  %s605_s20 = int_to_ptr.vmem [resolvable:$false] %s604_s20 }
  0x1f   : > { %p602_p5 = pnand %p600_p3, %p588_p2  ;;  %s606_s21 = scalar_lea.vmem %s605_s20, 512 }
  0x20   : > { %p607_p7 = scmp.lt.s32.totalorder %s150_s10, %s605_s20  ;;  %p608_p10 = scmp.lt.s32.totalorder %s606_s21, %s599_s13 }
  0x21   : > { %p603_p6 = pneg %p602_p5 }
  0x22   : > { %p609_p12 = por %p608_p10, %p607_p7 }
  0x24   : > { %p610_p4 = pnand %p609_p12, %p603_p6 }
  0x26   : > { %613 = shalt.err (!%p610_p4)
}
  0x27   : > { %s730_s23 = smov 128   ;;  %s731_s24 = smov 8  }
  0x28   : > { %503 = dma.hbm_to_vmem [thread:$0]  (!%p830_p0), %s148_s8, 256, %s150_s10, %s138_s12, %s730_s23, %s730_s23, %s731_s24  }
  0x29   : > { %p157_p13 = scmp.lt.s32.totalorder %s726_s0, 3 }
  0x2b   : > { %p158_p2 = pnand %p469_p1, %p157_p13 }
  0x2c   : > { %s843_s25 = sand.u32 (!%p158_p2), 1, %s710_s16  }
  0x2d   : > { %161 = sbr.rel (%p158_p2) target bundleno = 457 (0x1c9), region = 24  ;;  %s470_s30 = sshll.u32 (!%p158_p2), %s843_s25, 4 }
  0x2e   : > { %s164_s4 = scalar_lea.sflag (!%p158_p2), [#allocation7], %s843_s25  ;;  %s167_s5 = scalar_lea.vmem (!%p158_p2), [#allocation6], %s470_s30 }
  0x32   : > { %693 = dma.done.wait (%p806_p8), %s164_s4, 256  }
  0x33   : > { %695 = vsyncadd (%p806_p8), %s164_s4, 4294967040  ;;  %s202_s6 = sld [smem:[#allocation5]]  ;;  %v732_v0 = vmov -1e+30   ;;  %v197_v1 = vld [vmem:[%s167_s5] sm:$0xff]  ;;  %v853_v2 = vld [vmem:[%s167_s5 + $0x8] sm:$0xff]  ;;  %v281_v59 = vlaneseq }
  0x34   : > { %195 = vst [vmem:[#allocation2] sm:$0x1] %v732_v0  ;;  %s471_s7 = sld [smem:[#allocation5 + $0x1]]  ;;  %v199_v4 = vmul.f32 %v197_v1, %v197_v1  ;;  %v200_v5 = vmul.f32 %v853_v2, %v197_v1  ;;  %v201_v7 = vmul.f32 %v853_v2, %v853_v2 }
  0x35   : > { %s472_s8 = sld [smem:[#allocation5 + $0x2]]  ;;  %v282_v62 = vshrl.u32 %v281_v59, 7 }
  0x36   : > { %s473_s9 = sld [smem:[#allocation5 + $0x3]] }
  0x37   : > { %s851_s10 = sld [smem:[#allocation5 + $0x4]]  ;;  %v285_v0 = vmul.u32 128, %v282_v62 }
  0x38   : > { %s475_s11 = sld [smem:[#allocation5 + $0x5]] }
  0x39   : > { %s476_s12 = sld [smem:[#allocation5 + $0x6]]  ;;  %v220_v3 = vstv %s202_s6 }
  0x3a   : > { %s477_s13 = sld [smem:[#allocation5 + $0x7]]  ;;  %v224_v6 = vstv %s471_s7  ;;  %v221_v8 = vmul.f32 %v220_v3, %v199_v4  ;;  %s488_s7 = sshll.u32 %s718_s18, 10  ;;  %v284_v3 = vand.u32 127, %v281_v59 }
  0x3b   : > { %s858_s26 = sld [smem:[#allocation5 + $0x8]]  ;;  %v227_v9 = vstv %s472_s8  ;;  %v225_v10 = vmul.f32 %v224_v6, %v200_v5  ;;  %s184_s8 = scalar_lea.vmem [#allocation9], %s843_s25 }
  0x3c   : > { %s860_s14 = sld [smem:[#allocation5 + $0x9]]  ;;  %v230_v12 = vstv %s473_s9  ;;  %v228_v14 = vmul.f32 %v227_v9, %v201_v7  ;;  %s489_s9 = sshll.u32 %s718_s18, 4 }
  0x3d   : > { %s862_s20 = sld [smem:[#allocation5 + $0xa]]  ;;  %v231_v18 = vmul.f32 %v230_v12, %v197_v1  ;;  %v233_v19 = vstv %s851_s10  ;;  %s345_s10 = sshll.u32 %s184_s8, 4  ;;  %s346_s10 = int_to_ptr.vmem [resolvable:$true] %s345_s10 }
  0x3e   : > { %s481_s21 = sld [smem:[#allocation5 + $0xb]]  ;;  %v222_v11 = vstv %s475_s11  ;;  %v234_v24 = vmul.f32 %v233_v19, %v853_v2 }
  0x3f   : > { %s482_s23 = sld [smem:[#allocation5 + $0xc]]  ;;  %v223_v13 = vadd.f32 %v222_v11, %v221_v8  ;;  %v239_v15 = vstv %s476_s12  ;;  %v733_v8 = vmov 0.0  }
  0x40   : > { %s483_s24 = sld [smem:[#allocation5 + $0xd]]  ;;  %v243_v16 = vstv %s477_s13  ;;  %v240_v20 = vmul.f32 %v239_v15, %v199_v4  ;;  %196 = vst [vmem:[#allocation3] sm:$0x1] %v733_v8  ;;  %v299_v15 = vld [vmem:[#allocation2] sm:$0x1]  ;;  %s343_s13 = scalar_lea.hbm %s951_s2, %s489_s9 }
  0x41   : > { %s864_s30 = sld [smem:[#allocation5 + $0xe]]  ;;  %v226_v17 = vadd.f32 %v225_v10, %v223_v13  ;;  %v246_v21 = vstv %s858_s26  ;;  %v244_v23 = vmul.f32 %v243_v16, %v200_v5  ;;  %v304_v16 = vsub.s32 0, %v282_v62  ;;  %s329_s26 = scalar_lea.sflag [#allocation8], %s843_s25 }
  0x42   : > { %s867_s4 = sld [smem:[#allocation5 + $0xf]]  ;;  %v249_v26 = vstv %s860_s14  ;;  %v247_v29 = vmul.f32 %v246_v21, %v201_v7  ;;  %s614_s14 = scalar_lea.vmem %s346_s10, 16 }
  0x43   : > { %s870_s5 = sld [smem:[#allocation5 + $0x10]]  ;;  %v229_v22 = vadd.f32 %v228_v14, %v226_v17  ;;  %v252_v31 = vstv %s862_s20  ;;  %v250_v34 = vmul.f32 %v249_v26, %v197_v1  ;;  %p615_p8 = scmp.ne.s32.totalorder %s346_s10, %s614_s14 }
  0x44   : > { %s487_s6 = sld [smem:[#allocation5 + $0x11]]  ;;  %v241_v25 = vstv %s481_s21  ;;  %v253_v39 = vmul.f32 %v252_v31, %v853_v2  ;;  %s734_s20 = smov [#allocation9]  }
  0x45   : > { %v232_v27 = vadd.f32 %v231_v18, %v229_v22  ;;  %v242_v28 = vadd.f32 %v241_v25, %v240_v20  ;;  %v258_v30 = vstv %s482_s23  ;;  %p616_p12 = pnand %p615_p8, %p810_p9  ;;  %s618_s21 = sshll.u32 %s734_s20, 4  ;;  %s619_s21 = int_to_ptr.vmem [resolvable:$false] %s618_s21 }
  0x46   : > { %v262_v32 = vstv %s483_s24  ;;  %v259_v35 = vmul.f32 %v258_v30, %v199_v4  ;;  %s620_s23 = scalar_lea.vmem %s619_s21, 32  ;;  %p621_p1 = scmp.lt.s32.totalorder %s346_s10, %s619_s21 }
  0x47   : > { %v245_v33 = vadd.f32 %v244_v23, %v242_v28  ;;  %v235_v36 = vadd.f32 %v234_v24, %v232_v27  ;;  %v265_v37 = vstv %s864_s30  ;;  %v263_v40 = vmul.f32 %v262_v32, %v200_v5  ;;  %p617_p0 = pneg %p616_p12  ;;  %p622_p3 = scmp.lt.s32.totalorder %s620_s23, %s614_s14 }
  0x48   : > { %v268_v42 = vstv %s867_s4  ;;  %v266_v45 = vmul.f32 %v265_v37, %v201_v7 }
  0x49   : > { %v248_v38 = vadd.f32 %v247_v29, %v245_v33  ;;  %v236_v46 = vmul.f32 1.442695, %v235_v36  ;;  %v271_v47 = vstv %s870_s5  ;;  %v269_v50 = vmul.f32 %v268_v42, %v197_v1  ;;  %p623_p5 = por %p622_p3, %p621_p1 }
  0x4a   : > { %v260_v41 = vstv %s487_s6  ;;  %v272_v53 = vmul.f32 %v271_v47, %v853_v2  ;;  %v286_v1 = vstv %s488_s7 }
  0x4b   : > { %v251_v43 = vadd.f32 %v250_v34, %v248_v38  ;;  %v261_v44 = vadd.f32 %v260_v41, %v259_v35  ;;  %566 = vpow2.f32 %v236_v46  ;;  %v287_v4 = vadd.s32 %v286_v1, %v285_v0  ;;  %p624_p6 = pnand %p623_p5, %p617_p0 }
  0x4d   : > { %v254_v48 = vadd.f32 %v253_v39, %v251_v43  ;;  %v264_v49 = vadd.f32 %v263_v40, %v261_v44  ;;  %v288_v2 = vadd.s32 %v287_v4, %v284_v3 }
  0x4f   : > { %v255_v51 = vmul.f32 1.442695, %v254_v48  ;;  %v267_v52 = vadd.f32 %v266_v45, %v264_v49  ;;  %vm289_vm0 = vcmp.lt.s32.totalorder %v288_v2, 8 }
  0x51   : > { %568 = vpow2.f32 %v255_v51  ;;  %v270_v54 = vadd.f32 %v269_v50, %v267_v52 }
  0x53   : > { %v273_v55 = vadd.f32 %v272_v53, %v270_v54 }
  0x55   : > { %v274_v56 = vmul.f32 1.442695, %v273_v55 }
  0x57   : > { %570 = vpow2.f32 %v274_v56 }
  0x58   : > { %v567_v57 = vpop.eup %566 }
  0x5e   : > { %v569_v58 = vpop.eup %568 }
  0x5f   : > { %v257_v60 = vadd.f32 %v569_v58, %v567_v57 }
  0x64   : > { %v571_v61 = vpop.eup %570 }
  0x65   : > { %v276_v63 = vadd.f32 %v571_v61, %v257_v60 }
  0x67   : > { %572 = vlog2.f32 %v276_v63 }
  0x74   : > { %v573_v5 = vpop.eup %572 }
  0x75   : > { %v278_v6 = vmul.f32 0.6931472, %v573_v5 }
  0x77   : > { %v290_v7 = vsel %vm289_vm0, %v278_v6, -1e+30 }
  0x78   : > { %291 = vmax.xlane.f32.xlu0 %v290_v7 }
 0x101   : > { %v292_v9 = vpop.xlane.xlu0 %291 }
 0x102   : > { %v293_v10 = vrot.slane %v292_v9, 4 }
 0x104   : > { %v294_v11 = vmax.f32 %v292_v9, %v293_v10 }
 0x106   : > { %v295_v12 = vrot.slane %v294_v11, 2 }
 0x108   : > { %v296_v13 = vmax.f32 %v294_v11, %v295_v12 }
 0x10a   : > { %v297_v14 = vrot.slane %v296_v13, 1 }
 0x10c   : > { %v298_v17 = vmax.f32 %v296_v13, %v297_v14 }
 0x10e   : > { %v300_v18 = vmax.f32 %v299_v15, %v298_v17 }
 0x110   : > { %v305_v19 = vrot.slane %v300_v18, %v304_v16  ;;  %v319_v20 = vsub.f32 %v299_v15, %v300_v18  ;;  %324 = vst [vmem:[#allocation2] sm:$0x1] %v300_v18  ;;  %326 = vst [vmem:[%s184_s8] sm:$0x1] %v300_v18 }
 0x112   : > { %v307_v21 = vsub.f32 %v290_v7, %v305_v19 }
 0x114   : > { %v308_v22 = vmul.f32 1.442695, %v307_v21 }
 0x116   : > { %574 = vpow2.f32 %v308_v22 }
 0x123   : > { %v575_v23 = vpop.eup %574 }
 0x124   : > { %310 = vadd.xlane.f32.xlu0 %v575_v23 }
 0x125   : > { %627 = shalt.err (!%p624_p6)
}
 0x126   : > { %s628_s24 = scalar_lea.hbm %s343_s13, 16  ;;  %s632_s5 = scalar_lea.hbm %s951_s2, 32 }
 0x127   : > { %p629_p7 = scmp.ne.s32.totalorder %s343_s13, %s628_s24  ;;  %p633_p13 = scmp.lt.s32.totalorder %s343_s13, %s951_s2 }
 0x128   : > { %p634_p2 = scmp.lt.s32.totalorder %s632_s5, %s628_s24 }
 0x129   : > { %p630_p10 = pnand %p629_p7, %p810_p9 }
 0x12a   : > { %p635_p8 = por %p634_p2, %p633_p13 }
 0x12b   : > { %p631_p4 = pneg %p630_p10 }
 0x12d   : > { %p636_p12 = pnand %p635_p8, %p631_p4 }
 0x12f   : > { %639 = shalt.err (!%p636_p12)
}
 0x130   : > { %496 = dma.vmem_to_hbm [thread:$0]  (%p810_p9), %s346_s10, 16, %s343_s13, %s329_s26   ;;  %v320_v24 = vmul.f32 1.442695, %v319_v20  ;;  %v318_v31 = vld [vmem:[#allocation3] sm:$0x1] }
 0x131   : > { %s190_s8 = scalar_lea.vmem [#allocation10], %s843_s25  ;;  %s907_s13 = scalar_lea.hbm %s952_s3, %s489_s9 }
 0x132   : > { %576 = vpow2.f32 %v320_v24  ;;  %s358_s11 = sshll.u32 %s190_s8, 4  ;;  %s333_s26 = scalar_lea.sflag [#allocation11], %s843_s25  ;;  %s359_s11 = int_to_ptr.vmem [resolvable:$true] %s358_s11 }
 0x133   : > { %s640_s14 = scalar_lea.vmem %s359_s11, 16  ;;  %s735_s20 = smov [#allocation10]  }
 0x134   : > { %p641_p0 = scmp.ne.s32.totalorder %s359_s11, %s640_s14  ;;  %s644_s21 = sshll.u32 %s735_s20, 4  ;;  %s645_s21 = int_to_ptr.vmem [resolvable:$false] %s644_s21 }
 0x135   : > { %s646_s23 = scalar_lea.vmem %s645_s21, 32  ;;  %p647_p5 = scmp.lt.s32.totalorder %s359_s11, %s645_s21 }
 0x136   : > { %p642_p1 = pnand %p641_p0, %p810_p9  ;;  %p648_p6 = scmp.lt.s32.totalorder %s646_s23, %s640_s14 }
 0x138   : > { %p643_p3 = pneg %p642_p1  ;;  %p649_p7 = por %p648_p6, %p647_p5 }
 0x13a   : > { %p650_p10 = pnand %p649_p7, %p643_p3 }
 0x13f   : > { %v577_v30 = vpop.eup %576 }
 0x140   : > { %v322_v33 = vmul.f32 %v577_v30, %v318_v31 }
 0x1ad   : > { %v311_v25 = vpop.xlane.xlu0 %310 }
 0x1ae   : > { %v312_v26 = vrot.slane %v311_v25, 4 }
 0x1b0   : > { %v313_v27 = vadd.f32 %v312_v26, %v311_v25 }
 0x1b2   : > { %v314_v28 = vrot.slane %v313_v27, 2 }
 0x1b4   : > { %v315_v29 = vadd.f32 %v314_v28, %v313_v27 }
 0x1b6   : > { %v316_v32 = vrot.slane %v315_v29, 1 }
 0x1b8   : > { %v317_v34 = vadd.f32 %v316_v32, %v315_v29 }
 0x1ba   : > { %v323_v35 = vadd.f32 %v322_v33, %v317_v34 }
 0x1bc   : > { %325 = vst [vmem:[#allocation3] sm:$0x1] %v323_v35  ;;  %327 = vst [vmem:[%s190_s8] sm:$0x1] %v323_v35 }
 0x1bd   : > { %653 = shalt.err (!%p650_p10)
}
 0x1be   : > { %s654_s18 = scalar_lea.hbm %s907_s13, 16  ;;  %s658_s24 = scalar_lea.hbm %s952_s3, 32 }
 0x1bf   : > { %p655_p4 = scmp.ne.s32.totalorder %s907_s13, %s654_s18  ;;  %p659_p8 = scmp.lt.s32.totalorder %s907_s13, %s952_s3 }
 0x1c0   : > { %p660_p12 = scmp.lt.s32.totalorder %s658_s24, %s654_s18 }
 0x1c1   : > { %p656_p13 = pnand %p655_p4, %p810_p9 }
 0x1c2   : > { %p661_p0 = por %p660_p12, %p659_p8 }
 0x1c3   : > { %p657_p2 = pneg %p656_p13 }
 0x1c5   : > { %p662_p1 = pnand %p661_p0, %p657_p2 }
 0x1c7   : > { %665 = shalt.err (!%p662_p1)
}
 0x1c8   : > { %497 = dma.vmem_to_hbm [thread:$0]  (%p810_p9), %s359_s11, 16, %s907_s13, %s333_s26  }
 0x1c9 PF: > { %s370_s5 = sand.u32 1, %s706_s15   ;;  %p958_p3 = scmp.ge.s32.totalorder %s726_s0, 2 }
 0x1ca   : > { %s371_s6 = scalar_lea.sflag [#allocation8], %s370_s5 }
 0x1cb   : > { %p505_p5 = pnand %p958_p3, %p817_p11 }
 0x1cd   : > { %p506_p6 = pneg %p505_p5 }
 0x1cf   : > { %697 = dma.done.wait (%p506_p6), %s371_s6, 16  }
 0x1d0   : > { %699 = vsyncadd (%p506_p6), %s371_s6, 4294967280  ;;  %s379_s7 = scalar_lea.sflag [#allocation11], %s370_s5 }
 0x1d1   : > { %701 = dma.done.wait (%p506_p6), %s379_s7, 16  }
 0x1d2   : > { %703 = vsyncadd (%p506_p6), %s379_s7, 4294967280  ;;  %s27_s0 = sadd.s32 1, %s726_s0   ;;  %s959_s15 = smov %s710_s16 }
 0x1d3   : > { %p24_p7 = scmp.ge.s32.totalorder %s27_s0, 4   ;;  %s960_s16 = smov %s714_s17 }
 0x1d4   : > { %s961_s17 = smov %s815_s28  ;;  %s962_s18 = smov %s722_s19 }
 0x1d5   : > { %s963_s19 = smov %s965_s22  ;;  %26 = sbr.rel (!%p24_p7) target bundleno = 13 (0xd), region = 90 }
 0x1da   :  { %383 = vsyncpa [#allocation7], 1 }
 0x1db   :  { %385 = vsyncpa [#allocation7 + $0x1], 1 }
 0x1dc   :  { %386 = vsyncpa [#allocation8], 1 }
 0x1dd   :  { %388 = vsyncpa [#allocation8 + $0x1], 1 }
 0x1de   :  { %389 = vsyncpa [#allocation11], 1 }
 0x1df   :  { %391 = vsyncpa [#allocation11 + $0x1], 1 }

</bundles_post_ra>
